<compile_context>
chip_gen: v6e
topology: v6e:2x2x1
jax: 0.10.0
libtpu: 0.0.40
codegen_flags: <defaults>
</compile_context>

<pallas_src>
import functools

import jax
import jax.numpy as jnp
from jax.experimental import pallas as pl
from jax.experimental.pallas import tpu as pltpu

_HI = jax.lax.Precision.HIGHEST


def _round_up(v, m):
    return ((v + m - 1) // m) * m


def _vmem_capacity_bytes():
    try:
        return int(pltpu.get_tpu_info().vmem_capacity_bytes)
    except Exception:
        return 64 << 20   # conservative: v7x per-TensorCore VMEM


# ---------------------------------------------------------------------------
# Kernel 1: 'add' / 'mean' aggregation  (adj @ y accumulated over k tiles).
#   grid = (batch_or_1, row_tiles, reduction_tiles)   (reduction axis last)
# ---------------------------------------------------------------------------
def _agg_sum_kernel(adj_ref, y_ref, r_ref, *rest, aggr, premul, nb, f_in):
    if premul:
        out_ref, acc_ref, deg_ref = rest
        w_ref = None
    else:
        w_ref, out_ref, acc_ref, deg_ref = rest

    k = pl.program_id(2)
    nk = pl.num_programs(2)

    @pl.when(k == 0)
    def _init():
        acc_ref[...] = jnp.zeros_like(acc_ref)
        deg_ref[...] = jnp.zeros_like(deg_ref)

    adj = adj_ref[0]                                          # (TM, TK)
    acc_ref[...] += jnp.dot(adj, y_ref[0],
                            preferred_element_type=jnp.float32)
    if aggr == 'mean':
        deg_ref[...] += jnp.sum(adj.astype(jnp.float32), axis=-1,
                                keepdims=True)

    @pl.when(k == nk - 1)
    def _finalize():
        agg = acc_ref[...]                                    # (TM, Wacc) f32
        if aggr == 'mean':
            agg = agg / jnp.maximum(deg_ref[...], 1.0)
        if premul:
            out = agg                                         # W_rel already applied
        else:
            w = w_ref[...]                                    # (F_in, F_out) f32
            if nb == 1:
                out = jnp.dot(agg, w, preferred_element_type=jnp.float32)
            else:
                # flattened-batch, per-batch finalize matmuls (once per m-tile)
                parts = [
                    jnp.dot(agg[:, b * f_in:(b + 1) * f_in], w,
                            preferred_element_type=jnp.float32)
                    for b in range(nb)
                ]
                out = jnp.concatenate(parts, axis=-1)
        out = out + r_ref[0]                                  # lin_root + bias (f32)
        out_ref[0] = out.astype(out_ref.dtype)


# ---------------------------------------------------------------------------
# Kernel 2: 'max' aggregation (torch semantics: out[j] = max_i x[i] over
# adj[i, j] != 0).  Running (TM, F_in) max, 8 source rows at a time — no
# (TK, TM, F_in) intermediate.
# ---------------------------------------------------------------------------
def _agg_max_kernel(adjT_ref, x_ref, r_ref, w_ref, out_ref, acc_ref, *, chunk):
    k = pl.program_id(2)
    nk = pl.num_programs(2)

    @pl.when(k == 0)
    def _init():
        acc_ref[...] = jnp.full(acc_ref.shape, -jnp.inf, acc_ref.dtype)

    slab = adjT_ref[0]                                        # (TK, TM) = adj[i, j]
    xk = x_ref[0].astype(jnp.float32)                         # (TK, F_in)
    tk = slab.shape[0]
    nch = max(tk // chunk, 1)
    for c in range(nch):                                      # static, small trip count
        a_c = slab[c * chunk:(c + 1) * chunk, :]              # (C, TM)
        x_c = xk[c * chunk:(c + 1) * chunk, :]                # (C, F_in)
        cand = jnp.where(a_c[:, :, None] != 0, x_c[:, None, :], -jnp.inf)
        acc_ref[...] = jnp.maximum(acc_ref[...], jnp.max(cand, axis=0))

    @pl.when(k == nk - 1)
    def _finalize():
        agg = acc_ref[...]
        agg = jnp.where(agg == -jnp.inf, 0.0, agg)
        out = jnp.dot(agg, w_ref[...], preferred_element_type=jnp.float32)
        out = out + r_ref[0]
        out_ref[0] = out.astype(out_ref.dtype)


# ---------------------------------------------------------------------------
# Wrapper
# ---------------------------------------------------------------------------
def dense_graph_conv(x, adj, w_rel, b_rel, w_root, mask=None, *, aggr='add'):
    """Pallas-TPU forward of torch_geometric's DenseGraphConv.

    x:      [B, N, F_in] or [N, F_in]
    adj:    [B, N, N] or [N, N] (shared across the batch)
    w_rel:  [F_out, F_in]  (torch Linear layout), b_rel: [F_out]
    w_root: [F_out, F_in]
    mask:   optional [B, N]
    """
    assert aggr in ('add', 'mean', 'max')
    if x.ndim == 2:
        x = x[None]
    if adj.ndim == 2:
        adj = adj[None]
    B, N, F_in = x.shape
    F_out = w_rel.shape[0]
    out_dtype = x.dtype
    assert adj.shape[0] in (1, B) and adj.shape[1] == N and adj.shape[2] == N

    shared_adj = (adj.shape[0] == 1)

    # ---- cheap host-side pre-computation (O(B*N*F) XLA matmuls) ------------
    x32 = x.astype(jnp.float32)
    w_rel_t = jnp.transpose(w_rel).astype(jnp.float32)        # (F_in, F_out)
    w_root_t = jnp.transpose(w_root).astype(jnp.float32)      # (F_in, F_out)
    # lin_root + lin_rel bias, added once in the kernel epilogue.
    r = jnp.matmul(x32, w_root_t, precision=_HI) + b_rel.astype(jnp.float32)

    # Right-multiply-first when it shrinks the aggregated width.
    premul = (aggr != 'max') and (F_out <= F_in)
    if premul:
        y = jnp.matmul(x32, w_rel_t, precision=_HI).astype(x.dtype)
        Wy = F_out
    else:
        y = x
        Wy = F_in

    # Shared-adjacency batch flattening (add/mean only): adj read ONCE.
    flatten = (aggr != 'max') and shared_adj and (B * max(Wy, F_out) <= 8192)
    nb = B if flatten else 1
    wy_tot = nb * Wy
    wout_tot = nb * F_out

    # ---- tile selection (feature-aware VMEM budget) -------------------------
    vmem_cap = _vmem_capacity_bytes()
    target = min(int(vmem_cap * 0.45), 48 << 20)
    isz_x = jnp.dtype(x.dtype).itemsize
    isz_adj = isz_x                           # adjacency is cast to x.dtype
    isz_out = jnp.dtype(out_dtype).itemsize
    chunk_max = 8

    if aggr == 'max':
        def needed(tm, tk):
            n = 2 * (tm * tk * isz_adj + tk * F_in * isz_x
                     + tm * F_out * 4 + tm * F_out * isz_out)
            n += 2 * F_in * F_out * 4             # W_rel^T (double-buffered)
            n += tm * F_in * 4                    # running-max scratch
            n += chunk_max * tm * F_in * 4        # per-chunk select temp
            return n
        tm_cap, tk_cap = 256, 256
    else:
        w_bytes = 0 if premul else F_in * F_out * 4
        def needed(tm, tk):
            n = 2 * (tm * tk * isz_adj + tk * wy_tot * isz_x
                     + tm * wout_tot * 4 + tm * wout_tot * isz_out)
            n += 2 * w_bytes
            n += tm * wy_tot * 4 + tm * 4         # accumulator + degree
            n += tm * wout_tot * 4                # finalize temporaries
            return n
        tm_cap, tk_cap = 256, 1024

    if N <= 256:
        Np, TM, TK = N, N, N                      # single full-array tile
    else:
        Np = _round_up(N, 128)
        def cands(cap):
            return [d * 128 for d in range(cap // 128, 0, -1)
                    if Np % (d * 128) == 0]
        tms, tks = cands(tm_cap), cands(tk_cap)
        TM, TK = tms[-1], tks[-1]
        picked = False
        for tm in tms:                            # keep TM large,
            for tk in tks:                        # trim TK first
                if needed(tm, tk) <= target:
                    TM, TK = tm, tk
                    picked = True
                    break
            if picked:
                break
    vmem_limit = int(min(vmem_cap,
                         max(needed(TM, TK) * 1.5 + (2 << 20), 32 << 20)))

    # ---- node-count padding (only when needed) -------------------------------
    def pad_nodes(a, axes):
        if Np == N:
            return a
        pads = [(0, 0)] * a.ndim
        for ax in axes:
            pads[ax] = (0, Np - a.shape[ax])
        return jnp.pad(a, pads)

    # NOTE: adjacency kept in x.dtype (exact for the f32 test); bf16 adjacency
    # would halve HBM traffic but is only exact for 0/1 adjacencies.
    adj_p = pad_nodes(adj, (1, 2)).astype(x.dtype)
    y_p = pad_nodes(y, (1,))
    r_p = pad_nodes(r, (1,))

    if flatten:
        # (B, Np, W) -> (1, Np, B*W): per-batch chunks concatenated on lanes.
        y_in = jnp.transpose(y_p, (1, 0, 2)).reshape(1, Np, wy_tot)
        r_in = jnp.transpose(r_p, (1, 0, 2)).reshape(1, Np, wout_tot)
        grid_b = 1
    else:
        y_in, r_in = y_p, r_p
        grid_b = B

    grid = (grid_b, Np // TM, Np // TK)
    _adj_b = (lambda b: 0) if shared_adj else (lambda b: b)

    if aggr == 'max':
        chunk = chunk_max if TK % chunk_max == 0 else TK
        kernel = functools.partial(_agg_max_kernel, chunk=chunk)
        in_specs = [
            # torch 'max' aggregates over adjacency *columns*: stream (TK, TM)
            # slabs adj[i in k-tile, j in m-tile].
            pl.BlockSpec((1, TK, TM), lambda b, m, k: (_adj_b(b), k, m)),
            pl.BlockSpec((1, TK, F_in), lambda b, m, k: (b, k, 0)),
            pl.BlockSpec((1, TM, F_out), lambda b, m, k: (b, m, 0)),
            pl.BlockSpec((F_in, F_out), lambda b, m, k: (0, 0)),
        ]
        inputs = [adj_p, y_in, r_in, w_rel_t]
        scratch = [pltpu.VMEM((TM, F_in), jnp.float32)]
    else:
        kernel = functools.partial(_agg_sum_kernel, aggr=aggr, premul=premul,
                                   nb=nb, f_in=F_in)
        in_specs = [
            pl.BlockSpec((1, TM, TK), lambda b, m, k: (_adj_b(b), m, k)),
            pl.BlockSpec((1, TK, wy_tot), lambda b, m, k: (b, k, 0)),
            pl.BlockSpec((1, TM, wout_tot), lambda b, m, k: (b, m, 0)),
        ]
        inputs = [adj_p, y_in, r_in]
        if not premul:
            in_specs.append(pl.BlockSpec((F_in, F_out),
                                         lambda b, m, k: (0, 0)))
            inputs.append(w_rel_t)
        scratch = [pltpu.VMEM((TM, wy_tot), jnp.float32),   # aggregation acc
                   pltpu.VMEM((TM, 1), jnp.float32)]        # degree

    # Advisory cost estimate (adjacency read once in the flattened path).
    adj_reads = 1 if flatten else grid_b
    if aggr == 'max':
        flops = 2 * B * Np * Np * F_in + 2 * B * Np * F_in * F_out
        y_width = F_in
    else:
        flops = 2 * Np * Np * B * Wy + (0 if premul
                                        else 2 * B * Np * F_in * F_out)
        y_width = wy_tot
    bytes_accessed = int(
        adj_reads * Np * Np * isz_adj
        + grid_b * (Np // TM) * Np * y_width * isz_x
        + grid_b * Np * wout_tot * (4 + isz_out)
        + F_in * F_out * 4)

    out = pl.pallas_call(
        kernel,
        out_shape=jax.ShapeDtypeStruct((grid_b, Np, wout_tot), out_dtype),
        grid_spec=pltpu.PrefetchScalarGridSpec(
            num_scalar_prefetch=0,
            grid=grid,
            in_specs=in_specs,
            out_specs=pl.BlockSpec((1, TM, wout_tot),
                                   lambda b, m, k: (b, m, 0)),
            scratch_shapes=scratch),
        compiler_params=pltpu.CompilerParams(
            dimension_semantics=("parallel", "parallel", "arbitrary"),
            vmem_limit_bytes=vmem_limit),
        cost_estimate=pl.CostEstimate(flops=int(flops), transcendentals=0,
                                      bytes_accessed=bytes_accessed),
    )(*inputs)

    if flatten:
        out = jnp.transpose(out.reshape(Np, B, F_out), (1, 0, 2))
    out = out[:, :N, :]
    if mask is not None:
        # fuses with the padding slice above; no dummy mask DMA in the kernel.
        out = out * mask.reshape(-1, N, 1).astype(out_dtype)
    return out


# ---------------------------------------------------------------------------
# Pure-JAX reference mirroring the PyTorch forward exactly.
# ---------------------------------------------------------------------------
def _reference(x, adj, w_rel, b_rel, w_root, mask=None, *, aggr='add'):
    if x.ndim == 2:
        x = x[None]
    if adj.ndim == 2:
        adj = adj[None]
    B, N, _ = x.shape
    adjf = jnp.broadcast_to(adj, (B, N, N)).astype(jnp.float32)
    xf = x.astype(jnp.float32)
    if aggr == 'add':
        out = jnp.matmul(adjf, xf, precision=_HI)
    elif aggr == 'mean':
        out = jnp.matmul(adjf, xf, precision=_HI)
        out = out / jnp.maximum(adjf.sum(-1, keepdims=True), 1.0)
    else:  # max — out[b, j, c] = max_i {x[b, i, c] : adj[b, i, j] != 0}
        expanded = jnp.where(adjf[..., None] != 0, xf[:, :, None, :], -jnp.inf)
        out = expanded.max(axis=1)
        out = jnp.where(out == -jnp.inf, 0.0, out)
    out = jnp.matmul(out, w_rel.T.astype(jnp.float32), precision=_HI)
    out = out + b_rel.astype(jnp.float32)
    out = out + jnp.matmul(xf, w_root.T.astype(jnp.float32), precision=_HI)
    if mask is not None:
        out = out * mask.reshape(-1, N, 1).astype(jnp.float32)
    return out.astype(x.dtype)


if __name__ == "__main__":
    key = jax.random.PRNGKey(0)
    B, N, F_in, F_out = 2, 16, 32, 32
    ks = jax.random.split(key, 8)

    x = jax.random.normal(ks[0], (B, N, F_in), dtype=jnp.float32)
    # Sparse 0/1 adjacency shared across the batch, non-symmetric so the
    # 'max' column semantics are actually exercised.
    adj = (jax.random.uniform(ks[1], (N, N)) < 0.3).astype(jnp.float32)
    bound = 1.0 / (F_in ** 0.5)
    w_rel = jax.random.uniform(ks[2], (F_out, F_in), minval=-bound, maxval=bound)
    b_rel = jax.random.uniform(ks[3], (F_out,), minval=-bound, maxval=bound)
    w_root = jax.random.uniform(ks[4], (F_out, F_in), minval=-bound, maxval=bound)
    mask = (jax.random.uniform(ks[5], (B, N)) < 0.8)

    def check(name, out, ref):
        out = jax.block_until_ready(out)
        ok = bool(jnp.allclose(out, ref, atol=2e-3, rtol=2e-3))
        if not ok:
            print(f"MISMATCH {name}: max_err="
                  f"{float(jnp.max(jnp.abs(out - ref)))}")
        return ok

    all_ok = True

    # Shared (2-D) adjacency — flattened fast path for add/mean, max kernel.
    for aggr in ('add', 'mean', 'max'):
        for m in (mask, None):
            o = dense_graph_conv(x, adj, w_rel, b_rel, w_root, m, aggr=aggr)
            r = _reference(x, adj, w_rel, b_rel, w_root, m, aggr=aggr)
            all_ok &= check(f"{aggr}/shared/mask={m is not None}", o, r)

    # Per-batch (non-shared) adjacency path.
    adj_batched = jnp.broadcast_to(adj, (B, N, N))
    o = dense_graph_conv(x, adj_batched, w_rel, b_rel, w_root, mask, aggr='add')
    r = _reference(x, adj_batched, w_rel, b_rel, w_root, mask, aggr='add')
    all_ok &= check("add/batched", o, r)

    # F_out > F_in exercises the finalize-matmul (non-premultiplied) paths.
    F_big = 96
    w_rel2 = jax.random.uniform(ks[6], (F_big, F_in), minval=-bound, maxval=bound)
    b_rel2 = jnp.zeros((F_big,), jnp.float32)
    w_root2 = jax.random.uniform(ks[7], (F_big, F_in), minval=-bound, maxval=bound)
    o = dense_graph_conv(x, adj, w_rel2, b_rel2, w_root2, mask, aggr='add')
    r = _reference(x, adj, w_rel2, b_rel2, w_root2, mask, aggr='add')
    all_ok &= check("add/shared/F_out>F_in", o, r)
    o = dense_graph_conv(x, adj_batched, w_rel2, b_rel2, w_root2, None, aggr='mean')
    r = _reference(x, adj_batched, w_rel2, b_rel2, w_root2, None, aggr='mean')
    all_ok &= check("mean/batched/F_out>F_in", o, r)

    # Larger N exercises node padding + the multi-tile row/reduction grid.
    N2 = 260
    k2 = jax.random.split(jax.random.PRNGKey(1), 3)
    x2 = jax.random.normal(k2[0], (B, N2, F_in), dtype=jnp.float32)
    adj2 = (jax.random.uniform(k2[1], (N2, N2)) < 0.05).astype(jnp.float32)
    mask2 = (jax.random.uniform(k2[2], (B, N2)) < 0.9)
    o = dense_graph_conv(x2, adj2, w_rel, b_rel, w_root, mask2, aggr='add')
    r = _reference(x2, adj2, w_rel, b_rel, w_root, mask2, aggr='add')
    all_ok &= check("add/shared/N=260", o, r)

    if all_ok:
        print("KERNEL_OK")
</pallas_src>

<mosaic_0001>
module attributes {stable_mosaic.version = 11 : i64} {
  func.func @_agg_sum_kernel(%arg0: i32, %arg1: i32, %arg2: i32, %arg3: memref<1x16x16xf32, #tpu.memory_space<vmem>>, %arg4: memref<1x16x64xf32, #tpu.memory_space<vmem>>, %arg5: memref<1x16x64xf32, #tpu.memory_space<vmem>>, %arg6: memref<1x16x64xf32, #tpu.memory_space<vmem>>, %arg7: memref<16x64xf32, #tpu.memory_space<vmem>>, %arg8: memref<16x1xf32, #tpu.memory_space<vmem>>) attributes {dimension_semantics = [#tpu.dimension_semantics<parallel>, #tpu.dimension_semantics<parallel>, #tpu.dimension_semantics<arbitrary>], iteration_bounds = array<i64: 1, 1, 1>, scalar_prefetch = 0 : i64, scratch_operands = 2 : i64, tpu.core_type = #tpu.core_type<tc>, window_params = [{transform_indices = @transform_0, window_bounds = array<i64: 1, 16, 16>}, {transform_indices = @transform_1, window_bounds = array<i64: 1, 16, 64>}, {transform_indices = @transform_2, window_bounds = array<i64: 1, 16, 64>}, {transform_indices = @transform_3, window_bounds = array<i64: 1, 16, 64>}]} {
    %c0_i32 = arith.constant 0 : i32
    %0 = arith.cmpi eq, %arg2, %c0_i32 : i32
    %1 = arith.extui %0 : i1 to i32
    %c0_i32_0 = arith.constant 0 : i32
    %2 = arith.cmpi ne, %1, %c0_i32_0 : i32
    scf.if %2 {
      %cst_12 = arith.constant 0.000000e+00 : f32
      %14 = vector.broadcast %cst_12 : f32 to vector<16x64xf32>
      %c0_13 = arith.constant 0 : index
      %c0_14 = arith.constant 0 : index
      %15 = vector.load %arg7[%c0_13, %c0_14] : memref<16x64xf32, #tpu.memory_space<vmem>>, vector<16x64xf32>
      tpu.vector_store %arg7[%c0_13, %c0_14], %14 {strides = array<i32>} : memref<16x64xf32, #tpu.memory_space<vmem>>, vector<16x64xf32>,
      %cst_15 = arith.constant 0.000000e+00 : f32
      %16 = vector.broadcast %cst_15 : f32 to vector<16x1xf32>
      %c0_16 = arith.constant 0 : index
      %c0_17 = arith.constant 0 : index
      %17 = vector.load %arg8[%c0_16, %c0_17] : memref<16x1xf32, #tpu.memory_space<vmem>>, vector<16x1xf32>
      tpu.vector_store %arg8[%c0_16, %c0_17], %16 {strides = array<i32>} : memref<16x1xf32, #tpu.memory_space<vmem>>, vector<16x1xf32>,
    } else {
    }
    %c0 = arith.constant 0 : index
    %c0_1 = arith.constant 0 : index
    %c0_2 = arith.constant 0 : index
    %3 = vector.load %arg3[%c0, %c0_1, %c0_2] : memref<1x16x16xf32, #tpu.memory_space<vmem>>, vector<1x16x16xf32>
    %4 = vector.shape_cast %3 : vector<1x16x16xf32> to vector<16x16xf32>
    %c0_3 = arith.constant 0 : index
    %c0_4 = arith.constant 0 : index
    %5 = vector.load %arg7[%c0_3, %c0_4] : memref<16x64xf32, #tpu.memory_space<vmem>>, vector<16x64xf32>
    %c0_5 = arith.constant 0 : index
    %c0_6 = arith.constant 0 : index
    %c0_7 = arith.constant 0 : index
    %6 = vector.load %arg4[%c0_5, %c0_6, %c0_7] : memref<1x16x64xf32, #tpu.memory_space<vmem>>, vector<1x16x64xf32>
    %7 = vector.shape_cast %6 : vector<1x16x64xf32> to vector<16x64xf32>
    %cst = arith.constant dense<0.000000e+00> : vector<16x64xf32>
    %8 = tpu.matmul %4, %7, %cst {dimension_numbers = #tpu.dot_dimension_numbers<[1], [0], [0], [1], [0, 0, 1, 1], [], []>} : vector<16x16xf32>, vector<16x64xf32>, vector<16x64xf32> -> vector<16x64xf32>
    %9 = arith.addf %5, %8 : vector<16x64xf32>
    %c0_8 = arith.constant 0 : index
    %c0_9 = arith.constant 0 : index
    %10 = vector.load %arg7[%c0_8, %c0_9] : memref<16x64xf32, #tpu.memory_space<vmem>>, vector<16x64xf32>
    tpu.vector_store %arg7[%c0_8, %c0_9], %9 {strides = array<i32>} : memref<16x64xf32, #tpu.memory_space<vmem>>, vector<16x64xf32>,
    %c0_i32_10 = arith.constant 0 : i32
    %11 = arith.cmpi eq, %arg2, %c0_i32_10 : i32
    %12 = arith.extui %11 : i1 to i32
    %c0_i32_11 = arith.constant 0 : i32
    %13 = arith.cmpi ne, %12, %c0_i32_11 : i32
    scf.if %13 {
      %c0_12 = arith.constant 0 : index
      %c0_13 = arith.constant 0 : index
      %14 = vector.load %arg7[%c0_12, %c0_13] : memref<16x64xf32, #tpu.memory_space<vmem>>, vector<16x64xf32>
      %c0_14 = arith.constant 0 : index
      %c0_15 = arith.constant 0 : index
      %c0_16 = arith.constant 0 : index
      %15 = vector.load %arg5[%c0_14, %c0_15, %c0_16] : memref<1x16x64xf32, #tpu.memory_space<vmem>>, vector<1x16x64xf32>
      %16 = vector.shape_cast %15 : vector<1x16x64xf32> to vector<16x64xf32>
      %17 = arith.addf %14, %16 : vector<16x64xf32>
      %c0_17 = arith.constant 0 : index
      %c0_18 = arith.constant 0 : index
      %c0_19 = arith.constant 0 : index
      %18 = vector.load %arg6[%c0_17, %c0_18, %c0_19] : memref<1x16x64xf32, #tpu.memory_space<vmem>>, vector<1x16x64xf32>
      %19 = vector.shape_cast %18 : vector<1x16x64xf32> to vector<16x64xf32>
      %20 = vector.shape_cast %17 : vector<16x64xf32> to vector<1x16x64xf32>
      tpu.vector_store %arg6[%c0_17, %c0_18, %c0_19], %20 {strides = array<i32>} : memref<1x16x64xf32, #tpu.memory_space<vmem>>, vector<1x16x64xf32>,
    } else {
    }
    return
  }
  func.func @transform_0(%arg0: i32, %arg1: i32, %arg2: i32) -> (i32, i32, i32) {
    %c0_i32 = arith.constant 0 : i32
    %c0_i32_0 = arith.constant 0 : i32
    return %c0_i32, %arg1, %arg2 : i32, i32, i32
  }
  func.func @transform_1(%arg0: i32, %arg1: i32, %arg2: i32) -> (i32, i32, i32) {
    %c0_i32 = arith.constant 0 : i32
    %c0_i32_0 = arith.constant 0 : i32
    return %arg0, %arg2, %c0_i32 : i32, i32, i32
  }
  func.func @transform_2(%arg0: i32, %arg1: i32, %arg2: i32) -> (i32, i32, i32) {
    %c0_i32 = arith.constant 0 : i32
    %c0_i32_0 = arith.constant 0 : i32
    return %arg0, %arg1, %c0_i32 : i32, i32, i32
  }
  func.func @transform_3(%arg0: i32, %arg1: i32, %arg2: i32) -> (i32, i32, i32) {
    %c0_i32 = arith.constant 0 : i32
    %c0_i32_0 = arith.constant 0 : i32
    return %arg0, %arg1, %c0_i32 : i32, i32, i32
  }
}

</mosaic_0001>

<bundles_post_ra>
// kernel: tpu_custom_call.1
= control target key start
LH: loop header
LB: loop body
LE: loop exit
PB: predicated region body
PF: predicated region fallthrough
CT: control target
= control target key end

     0   :  { %8 = vsyncpa [#allocation5], 0  ;;  %s351_s0 = inlined_call_operand.hbm [shape: f32[1,16,16], index: 0, kind: input, shape index: {}]   ;;  %s352_s1 = inlined_call_operand.hbm [shape: f32[1,16,64], index: 1, kind: input, shape index: {}]   ;;  %s353_s2 = inlined_call_operand.hbm [shape: f32[1,16,64], index: 2, kind: input, shape index: {}]   ;;  %s354_s3 = inlined_call_operand.hbm [shape: f32[1,16,64], index: 3, kind: output, shape index: {}]  }
   0x1   :  { %9 = vsyncpa [#allocation8], 0 }
   0x2   :  { %10 = vsyncpa [#allocation6], 0  ;;  %s294_s12 = smov [#allocation7]   ;;  %s295_s14 = smov [#allocation4]  }
   0x3   :  { %s28_s13 = sshll.u32 %s294_s12, 4  ;;  %s16_s15 = sshll.u32 %s295_s14, 4  ;;  %s29_s13 = int_to_ptr.vmem [resolvable:$true] %s28_s13  ;;  %s17_s15 = int_to_ptr.vmem [resolvable:$true] %s16_s15 }
   0x4   :  { %s216_s16 = scalar_lea.vmem %s29_s13, 256  ;;  %p221_p1 = scmp.lt.s32.totalorder %s29_s13, %s29_s13 }
   0x5   :  { %p217_p0 = scmp.ne.s32.totalorder %s29_s13, %s216_s16  ;;  %p222_p2 = scmp.lt.s32.totalorder %s216_s16, %s216_s16 }
   0x7   :  { %p223_p3 = por %p222_p2, %p221_p1 }
   0x9   :  { %p224_p4 = pnand %p223_p3, %p217_p0 }
   0xb   :  { %227 = shalt.err (!%p224_p4)
}
   0xc   :  { %s296_s17 = smov 128   ;;  %s297_s18 = smov 8  }
   0xd   :  { %34 = dma.hbm_to_vmem [thread:$0]  %s352_s1, 256, %s29_s13, [#allocation8], %s296_s17, %s296_s17, %s297_s18  }
   0xe   :  { %s236_s21 = scalar_lea.vmem %s17_s15, 256  ;;  %p241_p6 = scmp.lt.s32.totalorder %s17_s15, %s17_s15 }
   0xf   :  { %p237_p5 = scmp.ne.s32.totalorder %s17_s15, %s236_s21  ;;  %p242_p7 = scmp.lt.s32.totalorder %s236_s21, %s236_s21 }
  0x11   :  { %p243_p8 = por %p242_p7, %p241_p6 }
  0x13   :  { %p244_p9 = pnand %p243_p8, %p237_p5 }
  0x15   :  { %247 = shalt.err (!%p244_p9)
}
  0x16   :  { %22 = dma.hbm_to_vmem [thread:$0]  %s351_s0, 256, %s17_s15, [#allocation5], %s296_s17, %s296_s17, %s297_s18  }
  0x17   :  { %s298_s24 = smov [#allocation9]  }
  0x18   :  { %s40_s25 = sshll.u32 %s298_s24, 4  ;;  %s41_s25 = int_to_ptr.vmem [resolvable:$true] %s40_s25 }
  0x19   :  { %s256_s26 = scalar_lea.vmem %s41_s25, 256  ;;  %p261_p11 = scmp.lt.s32.totalorder %s41_s25, %s41_s25 }
  0x1a   :  { %p257_p10 = scmp.ne.s32.totalorder %s41_s25, %s256_s26  ;;  %p262_p12 = scmp.lt.s32.totalorder %s256_s26, %s256_s26 }
  0x1c   :  { %p263_p13 = por %p262_p12, %p261_p11 }
  0x1e   :  { %p264_p0 = pnand %p263_p13, %p257_p10 }
  0x20   :  { %267 = shalt.err (!%p264_p0)
}
  0x21   :  { %46 = dma.hbm_to_vmem [thread:$0]  %s353_s2, 256, %s41_s25, [#allocation8], %s296_s17, %s296_s17, %s297_s18  }
  0x22   :  { %288 = dma.done.wait [#allocation5], 256  }
  0x23   :  { %289 = vsyncadd [#allocation5], 4294967040 }
  0x24   :  { %290 = dma.done.wait [#allocation8], 512  }
  0x25   :  { %291 = vsyncadd [#allocation8], 4294966784  ;;  %vm60_vm0 = vcmask 523264   ;;  %v299_v0 = vmov 0.0   ;;  %vm72_vm1 = vcmask 130048   ;;  %v71_v1 = vld [vmem:[#allocation7 + $0x8] sm:$0xff] }
  0x26   :  { %62 = vst.msk [vmem:[#allocation2 + $0x8] sm:$0xff] %vm60_vm0, %v299_v0  ;;  %61 = vst.msk [vmem:[#allocation2] sm:$0xff] %vm60_vm0, %v299_v0  ;;  %v70_v2 = vld [vmem:[#allocation7] sm:$0xff]  ;;  %v66_v3 = vld [vmem:[#allocation4] sm:$0xff]  ;;  %194 = vmatprep.subr.mxu0 %v71_v1  ;;  %s300_s0 = smov [#allocation10]  }
  0x27   :  { %198 = vmatprep.mubr.msk.f32.mxu0 %vm72_vm1, %v66_v3  ;;  %195 = vmatpush3.msra.mxu0 %v71_v1  ;;  %v67_v4 = vld [vmem:[#allocation4 + $0x8] sm:$0xff]  ;;  %v164_v13 = vld [vmem:[#allocation9] sm:$0xff]  ;;  %s175_s2 = sshll.u32 %s300_s0, 4  ;;  %s176_s2 = int_to_ptr.vmem [resolvable:$true] %s175_s2 }
  0x28   :  { %196 = vmatprep.subr.mxu0 %v70_v2  ;;  %v165_v11 = vld [vmem:[#allocation9 + $0x8] sm:$0xff]  ;;  %s268_s28 = scalar_lea.vmem %s176_s2, 256  ;;  %p273_p2 = scmp.lt.s32.totalorder %s176_s2, %s176_s2 }
  0x29   :  { %197 = vmatpush3.msra.mxu0 %v70_v2  ;;  %p269_p1 = scmp.ne.s32.totalorder %s176_s2, %s268_s28  ;;  %p274_p3 = scmp.lt.s32.totalorder %s268_s28, %s268_s28 }
  0x2a   :  { %199 = vmatmul.mubr.msk.f32.vlgmr.msra.gmra.mxu0 %vm72_vm1, %v67_v4 }
  0x2b   :  { %p275_p4 = por %p274_p3, %p273_p2 }
  0x2d   :  { %v69_v5 = vld [vmem:[#allocation2 + $0x8] sm:$0xff]  ;;  %v68_v7 = vld [vmem:[#allocation2] sm:$0xff]  ;;  %p276_p5 = pnand %p275_p4, %p269_p1 }
  0xea   :  { %v200_v6 = vpop.f32.mrf.mxu0 }
  0xeb   :  { %v155_v8 = vadd.f32 %v200_v6, %v69_v5 }
  0xec   :  { %v145_v9 = vpop.f32.mrf.mxu0 }
  0xed   :  { %158 = vst.msk [vmem:[#allocation2 + $0x8] sm:$0xff] %vm60_vm0, %v155_v8  ;;  %v154_v10 = vadd.f32 %v145_v9, %v68_v7 }
  0xef   :  { %157 = vst.msk [vmem:[#allocation2] sm:$0xff] %vm60_vm0, %v154_v10 }
  0xf4   :  { %v163_v12 = vld [vmem:[#allocation2 + $0x8] sm:$0xff] }
  0xf5   :  { %v167_v14 = vadd.f32 %v165_v11, %v163_v12 }
  0xf6   :  { %v162_v15 = vld [vmem:[#allocation2] sm:$0xff] }
  0xf7   :  { %v166_v16 = vadd.f32 %v164_v13, %v162_v15  ;;  %169 = vst.msk [vmem:[#allocation10 + $0x8] sm:$0xff] %vm60_vm0, %v167_v14 }
  0xf9   :  { %168 = vst.msk [vmem:[#allocation10] sm:$0xff] %vm60_vm0, %v166_v16 }
  0xfa   :  { %279 = shalt.err (!%p276_p5)
}
  0xfb   :  { %181 = dma.vmem_to_hbm [thread:$0]  %s176_s2, 256, %s354_s3, [#allocation6], %s296_s17, %s296_s17, %s297_s18  }
  0xfc   :  { %292 = dma.done.wait [#allocation6], 256  }
  0xfd   :  { %293 = vsyncadd [#allocation6], 4294967040 }
  0xfe   :  { %185 = vsyncpa [#allocation5], 1 }
  0xff   :  { %186 = vsyncpa [#allocation8], 1 }
 0x100   :  { %187 = vsyncpa [#allocation6], 1 }

</bundles_post_ra>
